<compile_context>
chip_gen: v6e
topology: v6e:2x2x1
jax: 0.10.0
libtpu: 0.0.40
codegen_flags: <defaults>
</compile_context>

<pallas_src>
import functools

import jax
import jax.numpy as jnp
from jax.experimental import pallas as pl
from jax.experimental.pallas import tpu as pltpu


_MIN_SPLIT_BYTES = 512 * 1024   # above this, force >= _MIN_GRID_STEPS blocks
_MIN_GRID_STEPS = 4             # >= 2 blocks per TensorCore on dual-TC chips


def _quant_kernel(params_ref, x_ref, o_ref, *, int_max, eps):
    """Asymmetric quantize-dequantize of one (tile_rows, lanes) tile.

    params_ref (SMEM, shape (2,), f32): [delta, zero_float] — the raw module
    parameters. scale / zero_point derivation runs once per grid step on the
    scalar unit (never the binding slot for this mem-bound kernel).
    """
    delta = params_ref[0]
    zero_float = params_ref[1]

    scale = jnp.maximum(delta, jnp.float32(eps))
    inv_scale = 1.0 / scale
    zero_point = jnp.clip(jnp.round(zero_float), 0.0, int_max)
    # Fold zero_point into the clip bounds (exact: zero_point is integer
    # valued), removing two VALU ops per element.
    clip_lo = 0.0 - zero_point
    clip_hi = int_max - zero_point

    x = x_ref[...].astype(jnp.float32)
    q = jnp.clip(jnp.round(x * inv_scale), clip_lo, clip_hi)
    o_ref[...] = (scale * q).astype(o_ref.dtype)


def _tpu_block_budget():
    """Generation-aware target block size in bytes (per buffer)."""
    kind = ""
    try:
        kind = jax.devices()[0].device_kind.lower()
    except Exception:
        pass
    vmem_bytes = None
    try:
        vmem_bytes = int(pltpu.get_tpu_info().vmem_capacity_bytes)
    except Exception:
        vmem_bytes = None

    if "v7" in kind or (vmem_bytes is not None and vmem_bytes <= (64 << 20)):
        return 6 << 20   # v7x: ~3.2 TB/s HBM -> amortize 0.35us/step harder
    if "v5" in kind:
        return 2 << 20   # v5e: slower HBM already amortizes; smaller VMEM budget
    return 4 << 20       # v6e and default


def _choose_layout(total, itemsize, target_block_bytes):
    """Pick a lane-dense slab (lanes, n_rows) and block row count.

    Prefers a lane width that divides `total` exactly (no padding); a block of
    roughly `target_block_bytes`; and at least _MIN_GRID_STEPS grid steps for
    non-tiny tensors (megacore sharding + DMA/compute overlap). Ragged row
    counts are handled with a partial last block, so `tile_rows` is always a
    sublane multiple whenever more than one block is used.
    """
    lanes = None
    for cand in (1024, 512, 256, 128):
        if total % cand == 0:
            lanes = cand
            break
    if lanes is None:
        # Ragged total: keep wide lanes (pad <= lanes-1 elements) unless tiny.
        lanes = 1024 if total >= 1024 else 128

    n_rows = pl.cdiv(total, lanes)

    # Sublane alignment so partial-grid blocks satisfy the (8,128) rule.
    sub = {4: 8, 2: 16, 1: 32}.get(itemsize, 8)

    row_bytes = lanes * itemsize
    target_rows = max(sub, (target_block_bytes // row_bytes) // sub * sub)

    # Force >= _MIN_GRID_STEPS blocks for non-tiny tensors (both v7x TCs busy,
    # pipeline overlap). No-op for small tensors.
    if total * itemsize >= _MIN_SPLIT_BYTES and n_rows >= _MIN_GRID_STEPS * sub:
        split_rows = max(sub, (n_rows // _MIN_GRID_STEPS) // sub * sub)
        target_rows = min(target_rows, split_rows)

    if n_rows <= target_rows:
        tile_rows = n_rows          # single block == full array dims -> legal
    else:
        tile_rows = target_rows     # sublane multiple; last block may be partial

    grid_steps = pl.cdiv(n_rows, tile_rows)
    return lanes, n_rows, tile_rows, grid_steps


def asymmetric_uniform_quantize(x, delta, zero_float, *, n_bits=8, eps=1e-8):
    """Pallas forward for AsymmetricUniformQuantizer (per_channel=False)."""
    orig_shape = x.shape
    orig_dtype = x.dtype
    total = int(x.size)
    itemsize = jnp.dtype(orig_dtype).itemsize

    target_block_bytes = _tpu_block_budget()
    lanes, n_rows, tile_rows, grid_steps = _choose_layout(
        total, itemsize, target_block_bytes)

    padded_total = n_rows * lanes
    flat = x.reshape(-1)                       # native dtype through HBM
    if padded_total != total:
        # TODO(synk): ragged totals still take one small pad/slice round trip
        # (at most lanes-1 elements); a fully unpadded path needs 1-D manual
        # DMA tiling.
        flat = jnp.pad(flat, (0, padded_total - total))
    x2d = flat.reshape(n_rows, lanes)

    int_max = 2.0 ** n_bits - 1.0
    params = jnp.stack([jnp.asarray(delta, jnp.float32).reshape(()),
                        jnp.asarray(zero_float, jnp.float32).reshape(())])

    kernel = functools.partial(_quant_kernel, int_max=int_max, eps=float(eps))

    # VMEM budget: double-buffered input + output blocks, plus headroom.
    block_bytes = tile_rows * lanes * itemsize
    vmem_limit = int(min(max(4 * block_bytes + (2 << 20), 32 << 20), 48 << 20))

    out2d = pl.pallas_call(
        kernel,
        out_shape=jax.ShapeDtypeStruct((n_rows, lanes), orig_dtype),
        grid=(grid_steps,),
        in_specs=[
            pl.BlockSpec(memory_space=pltpu.MemorySpace.SMEM),    # [delta, zp_f]
            pl.BlockSpec((tile_rows, lanes), lambda i: (i, 0)),   # x tile
        ],
        out_specs=pl.BlockSpec((tile_rows, lanes), lambda i: (i, 0)),
        compiler_params=pltpu.CompilerParams(
            dimension_semantics=("parallel",),
            vmem_limit_bytes=vmem_limit),
        cost_estimate=pl.CostEstimate(
            flops=5 * total,
            transcendentals=0,
            bytes_accessed=2 * total * itemsize),
    )(params, x2d)

    if padded_total != total:
        return out2d.reshape(-1)[:total].reshape(orig_shape)
    return out2d.reshape(orig_shape)


def set_quant_range(x_min, x_max, *, n_bits=8, eps=1e-8):
    """Mirror of AsymmetricUniformQuantizer.set_quant_range (per-tensor)."""
    int_max = 2.0 ** n_bits - 1.0
    x_min = jnp.minimum(jnp.asarray(x_min, jnp.float32), 0.0)
    x_max = jnp.maximum(jnp.asarray(x_max, jnp.float32), eps)
    delta = (x_max - x_min) / int_max
    zero_float = -x_min / delta
    return delta, zero_float


def _reference_forward(x, delta, zero_float, *, n_bits=8, eps=1e-8,
                       use_reciprocal=False):
    """Pure-JAX reference of the PyTorch forward (for verification)."""
    int_min, int_max = 0.0, 2.0 ** n_bits - 1.0
    xf = x.astype(jnp.float32)
    scale = jnp.maximum(jnp.asarray(delta, jnp.float32), eps)
    zero_point = jnp.clip(jnp.round(jnp.asarray(zero_float, jnp.float32)),
                          int_min, int_max)
    if use_reciprocal:
        x_div = xf * (1.0 / scale)
    else:
        x_div = xf / scale
    x_int = jnp.clip(jnp.round(x_div) + zero_point, int_min, int_max)
    return (scale * (x_int - zero_point)).astype(x.dtype)


if __name__ == "__main__":
    n_bits = 8
    eps = 1e-8
    key = jax.random.PRNGKey(0)

    cases = [
        ((2, 4, 16, 16), jnp.float32),   # NCHW activation (primary example)
        ((256, 640), jnp.float32),       # forces >=4 grid steps
        ((250, 640), jnp.float32),       # partial last block (ragged rows)
        ((3, 5, 37), jnp.float32),       # ragged total (small pad fallback)
    ]

    for idx, (shape, dtype) in enumerate(cases):
        k = jax.random.fold_in(key, idx)
        x = (jax.random.normal(k, shape, dtype=jnp.float32) * 2.0 - 0.3
             ).astype(dtype)

        # Deterministic "calibration": equivalent to
        # set_quant_range(x.min(), x.max()) in the PyTorch module.
        delta, zero_float = set_quant_range(
            jnp.min(x.astype(jnp.float32)), jnp.max(x.astype(jnp.float32)),
            n_bits=n_bits, eps=eps)

        out = asymmetric_uniform_quantize(x, delta, zero_float,
                                          n_bits=n_bits, eps=eps)
        out = jax.block_until_ready(out)
        assert out.shape == x.shape and out.dtype == x.dtype

        # Exact check vs. a reference using the same reciprocal-multiply form.
        ref_mul = _reference_forward(x, delta, zero_float, n_bits=n_bits,
                                     eps=eps, use_reciprocal=True)
        assert jnp.allclose(out.astype(jnp.float32),
                            ref_mul.astype(jnp.float32),
                            atol=1e-6, rtol=0.0), \
            f"mismatch vs reciprocal reference, shape={shape}"

        # PyTorch-faithful division reference: round(x*(1/s)) may differ from
        # round(x/s) by one quantization step at .5 ties -> allow one LSB.
        ref_div = _reference_forward(x, delta, zero_float, n_bits=n_bits,
                                     eps=eps, use_reciprocal=False)
        scale = float(jnp.maximum(jnp.asarray(delta, jnp.float32), eps))
        max_err = float(jnp.max(jnp.abs(out.astype(jnp.float32)
                                        - ref_div.astype(jnp.float32))))
        assert max_err <= scale + 1e-6, \
            f"mismatch vs division reference beyond one quant step, shape={shape}"

    # TODO(synk): per_channel=True, trainable/fixed ranges, log scale-domain
    # and the STE backward pass (custom_vjp) are not implemented here (module
    # defaults are per-tensor, linear, forward-only).
    print("KERNEL_OK")
</pallas_src>

<mosaic_0001>
module attributes {stable_mosaic.version = 11 : i64} {
  func.func @_quant_kernel(%arg0: i32, %arg1: memref<2xf32, #tpu.memory_space<smem>>, %arg2: memref<2x1024xf32, #tpu.memory_space<vmem>>, %arg3: memref<2x1024xf32, #tpu.memory_space<vmem>>) attributes {dimension_semantics = [#tpu.dimension_semantics<parallel>], iteration_bounds = array<i64: 1>, scalar_prefetch = 0 : i64, scratch_operands = 0 : i64, tpu.core_type = #tpu.core_type<tc>, window_params = [{transform_indices = @transform_0, window_bounds = array<i64: 2>}, {transform_indices = @transform_1, window_bounds = array<i64: 2, 1024>}, {transform_indices = @transform_2, window_bounds = array<i64: 2, 1024>}]} {
    %c0 = arith.constant 0 : index
    %0 = memref.load %arg1[%c0] : memref<2xf32, #tpu.memory_space<smem>>
    %c1 = arith.constant 1 : index
    %1 = memref.load %arg1[%c1] : memref<2xf32, #tpu.memory_space<smem>>
    %cst = arith.constant 9.99999993E-9 : f32
    %2 = arith.maximumf %0, %cst : f32
    %cst_0 = arith.constant 1.000000e+00 : f32
    %3 = arith.divf %cst_0, %2 : f32
    %4 = math.roundeven %1 : f32
    %cst_1 = arith.constant 0.000000e+00 : f32
    %cst_2 = arith.constant 2.550000e+02 : f32
    %5 = arith.maximumf %cst_1, %4 : f32
    %6 = arith.minimumf %cst_2, %5 : f32
    %cst_3 = arith.constant 0.000000e+00 : f32
    %7 = arith.subf %cst_3, %6 : f32
    %cst_4 = arith.constant 2.550000e+02 : f32
    %8 = arith.subf %cst_4, %6 : f32
    %c0_5 = arith.constant 0 : index
    %c0_6 = arith.constant 0 : index
    %9 = vector.load %arg2[%c0_5, %c0_6] : memref<2x1024xf32, #tpu.memory_space<vmem>>, vector<2x1024xf32>
    %10 = vector.broadcast %3 : f32 to vector<2x1024xf32>
    %11 = arith.mulf %9, %10 : vector<2x1024xf32>
    %12 = math.roundeven %11 : vector<2x1024xf32>
    %13 = vector.broadcast %7 : f32 to vector<2x1024xf32>
    %14 = arith.maximumf %13, %12 : vector<2x1024xf32>
    %15 = vector.broadcast %8 : f32 to vector<2x1024xf32>
    %16 = arith.minimumf %15, %14 : vector<2x1024xf32>
    %17 = vector.broadcast %2 : f32 to vector<2x1024xf32>
    %18 = arith.mulf %17, %16 : vector<2x1024xf32>
    %c0_7 = arith.constant 0 : index
    %c0_8 = arith.constant 0 : index
    %19 = vector.load %arg3[%c0_7, %c0_8] : memref<2x1024xf32, #tpu.memory_space<vmem>>, vector<2x1024xf32>
    tpu.vector_store %arg3[%c0_7, %c0_8], %18 {strides = array<i32>} : memref<2x1024xf32, #tpu.memory_space<vmem>>, vector<2x1024xf32>,
    return
  }
  func.func @transform_0(%arg0: i32) -> i32 {
    %c0_i32 = arith.constant 0 : i32
    %c0_i32_0 = arith.constant 0 : i32
    return %c0_i32 : i32
  }
  func.func @transform_1(%arg0: i32) -> (i32, i32) {
    %c0_i32 = arith.constant 0 : i32
    %c0_i32_0 = arith.constant 0 : i32
    return %arg0, %c0_i32 : i32, i32
  }
  func.func @transform_2(%arg0: i32) -> (i32, i32) {
    %c0_i32 = arith.constant 0 : i32
    %c0_i32_0 = arith.constant 0 : i32
    return %arg0, %c0_i32 : i32, i32
  }
}

</mosaic_0001>

<bundles_post_ra>
// kernel: tpu_custom_call.1
= control target key start
LH: loop header
LB: loop body
LE: loop exit
PB: predicated region body
PF: predicated region fallthrough
CT: control target
= control target key end

     0   :  { %7 = vsyncpa [#allocation5], 0  ;;  %s198_s0 = inlined_call_operand.hbm [shape: f32[2], index: 0, kind: input, shape index: {}]   ;;  %s199_s1 = inlined_call_operand.hbm [shape: f32[2,1024], index: 1, kind: input, shape index: {}]   ;;  %s200_s2 = inlined_call_operand.hbm [shape: f32[2,1024], index: 2, kind: output, shape index: {}]  }
   0x1   :  { %8 = vsyncpa [#allocation3], 0 }
   0x2   :  { %9 = vsyncpa [#allocation4], 0  ;;  %s168_s9 = smov [#allocation2]   ;;  %s169_s12 = smov [#allocation6]  }
   0x3   :  { %17 = dma.hbm_to_smem %s198_s0, 16, %s168_s9, [#allocation5]  }
   0x4   :  { %s24_s13 = sshll.u32 %s169_s12, 4  ;;  %s25_s13 = int_to_ptr.vmem [resolvable:$true] %s24_s13 }
   0x5   :  { %s130_s14 = scalar_lea.vmem %s25_s13, 256  ;;  %p135_p1 = scmp.lt.s32.totalorder %s25_s13, %s25_s13 }
   0x6   :  { %p131_p0 = scmp.ne.s32.totalorder %s25_s13, %s130_s14  ;;  %p136_p2 = scmp.lt.s32.totalorder %s130_s14, %s130_s14 }
   0x8   :  { %p137_p3 = por %p136_p2, %p135_p1 }
   0xa   :  { %p138_p4 = pnand %p137_p3, %p131_p0 }
   0xc   :  { %141 = shalt.err (!%p138_p4)
}
   0xd   :  { %27 = dma.hbm_to_vmem [thread:$0]  %s199_s1, 256, %s25_s13, [#allocation3]  }
   0xe   :  { %162 = dma.done.wait [#allocation5], 16  }
   0xf   :  { %163 = vsyncadd [#allocation5], 4294967280 }
  0x10   :  { %164 = dma.done.wait [#allocation3], 256  }
  0x11   :  { %165 = vsyncadd [#allocation3], 4294967040 }
  0x12   :  { %34 = sfence }
  0x13   :  { %s35_s0 = sld [smem:[#allocation2]]  ;;  %s170_s17 = smov 1e-08   ;;  %v53_v2 = vld [vmem:[#allocation6] sm:$0xff]  ;;  %v54_v3 = vld [vmem:[#allocation6 + $0x8] sm:$0xff] }
  0x14   :  { %s87_s19 = sld [smem:[#allocation2 + $0x1]]  ;;  %s171_s26 = smov 0.0  }
  0x15   :  { %s172_s28 = smov 255.0   ;;  %s173_s4 = smov [#allocation7]  }
  0x16   :  { %s77_s5 = sshll.u32 %s173_s4, 4  ;;  %s78_s5 = int_to_ptr.vmem [resolvable:$true] %s77_s5 }
  0x17   :  { %s142_s6 = scalar_lea.vmem %s78_s5, 256  ;;  %p147_p7 = scmp.lt.s32.totalorder %s78_s5, %s78_s5 }
  0x18   :  { %p143_p6 = scmp.ne.s32.totalorder %s78_s5, %s142_s6  ;;  %p148_p8 = scmp.lt.s32.totalorder %s142_s6, %s142_s6 }
  0x19   :  { %s37_s18 = smax.f32 %s170_s17, %s35_s0 }
  0x1a   :  { %v38_v0 = vstv %s37_s18  ;;  %s41_s20 = scvt.f32.s32 %s87_s19  ;;  %s46_s22 = sand.u32 2147483647, %s87_s19 }
  0x1b   :  { %112 = vrcp.f32 %v38_v0  ;;  %s44_s24 = sand.u32 2147483648, %s87_s19  ;;  %p47_p5 = scmp.lt.f32.partialorder %s46_s22, 2.1474836e+09 }
  0x1c   :  { %s42_s21 = scvt.s32.f32 %s41_s20  ;;  %p149_p9 = por %p148_p8, %p147_p7 }
  0x1e   :  { %s43_s23 = sand.u32 2147483647, %s42_s21  ;;  %p150_p10 = pnand %p149_p9, %p143_p6 }
  0x1f   :  { %s45_s1 = sor.u32 %s44_s24, %s43_s23 }
  0x20   :  { %s202_s1 = smov (!%p47_p5, %s45_s1), %s87_s19 }
  0x21   :  { %s49_s27 = smax.f32 %s171_s26, %s202_s1 }
  0x22   :  { %s50_s29 = smin.f32 %s172_s28, %s49_s27 }
  0x23   :  { %s51_s30 = ssub.f32 0.0, %s50_s29 }
  0x24   :  { %s52_s3 = ssub.f32 255.0, %s50_s29 }
  0x25   :  { %v60_v18 = vstv %s51_s30 }
  0x26   :  { %v63_v21 = vstv %s52_s3 }
  0x28   :  { %v113_v1 = vpop.eup %112 }
  0x29   :  { %88 = vpush %v113_v1 }
  0x5a   :  { %s89_s25 = spop %88 }
  0x5b   :  { %v55_v4 = vstv %s89_s25 }
  0x5c   :  { %v56_v5 = vmul.f32 %v55_v4, %v53_v2  ;;  %v57_v6 = vmul.f32 %v55_v4, %v54_v3 }
  0x5e   :  { %v92_v7 = vcvt.f32.s32 %v56_v5  ;;  %v100_v8 = vcvt.f32.s32 %v57_v6  ;;  %v90_v10 = vand.u32 2147483647, %v56_v5  ;;  %v95_v13 = vand.u32 2147483648, %v56_v5 }
  0x5f   :  { %v98_v14 = vand.u32 2147483647, %v57_v6  ;;  %v103_v16 = vand.u32 2147483648, %v57_v6 }
  0x60   :  { %v93_v9 = vcvt.s32.f32 %v92_v7  ;;  %v101_v11 = vcvt.s32.f32 %v100_v8  ;;  %vm91_vm0 = vcmp.lt.f32.partialorder %v90_v10, 8388608.0 }
  0x61   :  { %vm99_vm1 = vcmp.lt.f32.partialorder %v98_v14, 8388608.0 }
  0x62   :  { %v94_v12 = vand.u32 2147483647, %v93_v9  ;;  %v102_v15 = vand.u32 2147483647, %v101_v11 }
  0x64   :  { %v96_v17 = vor.u32 %v95_v13, %v94_v12  ;;  %v104_v19 = vor.u32 %v103_v16, %v102_v15 }
  0x66   :  { %v97_v20 = vsel %vm91_vm0, %v96_v17, %v56_v5  ;;  %v105_v22 = vsel %vm99_vm1, %v104_v19, %v57_v6 }
  0x67   :  { %v61_v23 = vmax.f32 %v60_v18, %v97_v20  ;;  %v62_v24 = vmax.f32 %v60_v18, %v105_v22 }
  0x69   :  { %v64_v25 = vmin.f32 %v63_v21, %v61_v23  ;;  %v65_v26 = vmin.f32 %v63_v21, %v62_v24 }
  0x6b   :  { %v67_v27 = vmul.f32 %v64_v25, %v38_v0  ;;  %v68_v28 = vmul.f32 %v65_v26, %v38_v0 }
  0x6d   :  { %69 = vst [vmem:[#allocation7] sm:$0xff] %v67_v27  ;;  %70 = vst [vmem:[#allocation7 + $0x8] sm:$0xff] %v68_v28 }
  0x6e   :  { %153 = shalt.err (!%p150_p10)
}
  0x6f   :  { %80 = dma.vmem_to_hbm [thread:$0]  %s78_s5, 256, %s200_s2, [#allocation4]  }
  0x70   :  { %166 = dma.done.wait [#allocation4], 256  }
  0x71   :  { %167 = vsyncadd [#allocation4], 4294967040 }
  0x72   :  { %84 = vsyncpa [#allocation3], 1 }
  0x73   :  { %85 = vsyncpa [#allocation4], 1 }
  0x74   :  { %86 = vsyncpa [#allocation5], 1 }

</bundles_post_ra>
